<compile_context>
chip_gen: v7x
topology: tpu7x:2x2x1
jax: 0.10.0
libtpu: 0.0.40
codegen_flags: <defaults>
</compile_context>

<pallas_src>
import functools

import jax
import jax.numpy as jnp
from jax.experimental import pallas as pl
from jax.experimental.pallas import tpu as pltpu


def _round_up(x, m):
    return (x + m - 1) // m * m


def _vmem_budget_bytes():
    """Generation-aware per-core VMEM budget (leave ~25% compiler headroom)."""
    cap = 64 * 2**20
    try:
        info = pltpu.get_tpu_info()
        cap = int(getattr(info, "vmem_capacity_bytes", cap))
    except Exception:
        pass
    # ~48 MiB on v7x (64 MiB/TC), ~96 MiB on v5e/v6e (128 MiB), hard cap 100 MiB.
    return int(min(cap * 3 // 4, 100 * 2**20))


def _estimate_vmem(tile_b, in_f, tn, n_out, hid_p, csize, xsize, osize):
    """Rough per-step VMEM footprint for the tiling below."""
    wcb_bufs = 1 if n_out == 1 else 2                      # invariant -> single buffer
    resident = in_f * hid_p * csize + hid_p * 4            # w1 + b1 (Buffered(1))
    per_j = wcb_bufs * ((in_f + hid_p) * 2 * tn * csize + 2 * 2 * tn * 4)
    io = 2 * tile_b * in_f * xsize + 2 * tile_b * tn * osize   # x / out double-buffered
    scratch = tile_b * hid_p * csize                        # cached selector hidden
    temps = 4 * tile_b * 2 * tn * 4                         # f32 temporaries headroom
    return resident + per_j + io + scratch + temps


def _choose_out_tile(in_f, out_f, hid_p, tile_b_hint, csize, budget):
    """Pick the OUT tile so resident+pipelined weights fit the VMEM budget."""
    out_p0 = _round_up(out_f, 128)
    n_out = 1
    while True:
        tn = _round_up(pl.cdiv(out_p0, n_out), 128)
        need = _estimate_vmem(tile_b_hint, in_f, tn, n_out, hid_p, csize, 4, 4)
        if need <= budget or tn <= 128:
            n_fin = pl.cdiv(out_p0, tn)
            return n_fin, tn
        n_out *= 2


def prepare_params(params, compute_dtype=jnp.bfloat16, *, tile_b_hint=512, out_tile=None):
    """One-time weight layout prep (hoisted out of the per-call path)."""
    OUT, IN = params["color_w"].shape
    HID = params["sel_w1"].shape[0]
    HID_P = _round_up(HID, 128)
    csize = jnp.dtype(compute_dtype).itemsize
    budget = _vmem_budget_bytes()

    if out_tile is None:
        n_out, tn = _choose_out_tile(IN, OUT, HID_P, tile_b_hint, csize, budget)
    else:
        tn = _round_up(int(out_tile), 128)
        n_out = pl.cdiv(_round_up(OUT, 128), tn)
    OUT_P = n_out * tn
    pad_o = OUT_P - OUT
    pad_h = HID_P - HID

    # Color / brightness weights, block-interleaved per OUT tile:
    # tile j occupies columns [j*2*tn, (j+1)*2*tn) = [color_j | bright_j].
    wc = jnp.pad(params["color_w"].T, ((0, 0), (0, pad_o)))      # (IN, OUT_P)
    wb = jnp.pad(params["bright_w"].T, ((0, 0), (0, pad_o)))
    w_cb = jnp.concatenate(
        [wc.reshape(IN, n_out, 1, tn), wb.reshape(IN, n_out, 1, tn)], axis=2
    ).reshape(IN, 2 * OUT_P).astype(compute_dtype)

    bc = jnp.pad(params["color_b"], (0, pad_o))
    bb = jnp.pad(params["bright_b"], (0, pad_o))
    b_cb = jnp.concatenate(
        [bc.reshape(n_out, 1, tn), bb.reshape(n_out, 1, tn)], axis=1
    ).reshape(1, 2 * OUT_P).astype(jnp.float32)

    # Selector hidden layer (resident, HID padded to lane width).
    w1 = jnp.pad(params["sel_w1"].T, ((0, 0), (0, pad_h))).astype(compute_dtype)  # (IN, HID_P)
    b1 = jnp.pad(params["sel_b1"], (0, pad_h)).reshape(1, HID_P).astype(jnp.float32)

    # PyTorch's view(-1, OUT, 2): even columns of the selector output are the
    # color gate, odd columns the brightness gate. Block-interleave per OUT tile.
    w2 = jnp.pad(params["sel_w2"].T, ((0, pad_h), (0, 0)))        # (HID_P, 2*OUT)
    w2e = jnp.pad(w2[:, 0::2], ((0, 0), (0, pad_o)))              # color gate
    w2o = jnp.pad(w2[:, 1::2], ((0, 0), (0, pad_o)))              # brightness gate
    w2_cb = jnp.concatenate(
        [w2e.reshape(HID_P, n_out, 1, tn), w2o.reshape(HID_P, n_out, 1, tn)], axis=2
    ).reshape(HID_P, 2 * OUT_P).astype(compute_dtype)

    b2e = jnp.pad(params["sel_b2"][0::2], (0, pad_o))
    b2o = jnp.pad(params["sel_b2"][1::2], (0, pad_o))
    b2_cb = jnp.concatenate(
        [b2e.reshape(n_out, 1, tn), b2o.reshape(n_out, 1, tn)], axis=1
    ).reshape(1, 2 * OUT_P).astype(jnp.float32)

    return dict(w1=w1, b1=b1, w_cb=w_cb, b_cb=b_cb, w2_cb=w2_cb, b2_cb=b2_cb,
                in_features=IN, out_features=OUT, out_padded=OUT_P,
                out_tile=tn, n_out=n_out, hid_padded=HID_P,
                tile_b_hint=tile_b_hint)


def _adaptive_mwl_kernel(x_ref, w1_ref, b1_ref, wcb_ref, bcb_ref, w2cb_ref, b2cb_ref,
                         o_ref, h_ref, *, tn, approx_recip):
    """One (batch tile i, OUT tile j) grid step.

    x_ref   : (TB, IN)        activations (native dtype, cast in-kernel)
    w1_ref  : (IN, HID_P)     selector hidden weights (resident)
    b1_ref  : (1, HID_P)      selector hidden bias (f32)
    wcb_ref : (IN, 2*tn)      [color_j | bright_j] weights for OUT tile j
    bcb_ref : (1, 2*tn)       matching biases (f32)
    w2cb_ref: (HID_P, 2*tn)   [color-gate_j | bright-gate_j] selector weights
    b2cb_ref: (1, 2*tn)       matching biases (f32)
    o_ref   : (TB, tn)
    h_ref   : (TB, HID_P)     VMEM scratch, selector hidden cached across j
    """
    j = pl.program_id(1)
    cdtype = w1_ref.dtype
    x = x_ref[...].astype(cdtype)

    # Selector hidden layer: compute once per batch tile, reuse for every j.
    @pl.when(j == 0)
    def _():
        h = jnp.dot(x, w1_ref[...], preferred_element_type=jnp.float32) + b1_ref[...]
        h_ref[...] = jnp.maximum(h, 0.0).astype(h_ref.dtype)

    # Fused color | brightness matmul for this OUT tile (lane-aligned halves).
    y = jnp.dot(x, wcb_ref[...], preferred_element_type=jnp.float32) + bcb_ref[...]
    y = jnp.maximum(y, 0.0)
    color = y[:, :tn]
    bright = y[:, tn:]

    # Fused gate-logit matmul for this OUT tile.
    s = jnp.dot(h_ref[...], w2cb_ref[...], preferred_element_type=jnp.float32) + b2cb_ref[...]
    # 2-way softmax == sigmoid of the logit difference (one exp, EUP recip).
    g = pl.reciprocal(1.0 + jnp.exp(s[:, tn:] - s[:, :tn]), approx=approx_recip)
    o_ref[...] = (bright + g * (color - bright)).astype(o_ref.dtype)


def _spec(shape, index_map, bufs=None):
    if bufs is None:
        return pl.BlockSpec(shape, index_map)
    return pl.BlockSpec(shape, index_map, pipeline_mode=pl.Buffered(bufs))


def adaptive_multi_weight_linear(x, prep, *, tile_b=None, out_dtype=None):
    """x: (B, in_features). prep: output of prepare_params()."""
    B, IN = x.shape
    assert IN == prep["in_features"]
    OUT = prep["out_features"]
    OUT_P, tn, n_out = prep["out_padded"], prep["out_tile"], prep["n_out"]
    HID_P = prep["hid_padded"]
    cdtype = prep["w_cb"].dtype
    out_dtype = out_dtype if out_dtype is not None else x.dtype

    csize = jnp.dtype(cdtype).itemsize
    xsize = jnp.dtype(x.dtype).itemsize
    osize = jnp.dtype(out_dtype).itemsize
    budget = _vmem_budget_bytes()

    # Batch tile: auto-size from the remaining VMEM budget unless given.
    if tile_b is None:
        tile_b = int(prep.get("tile_b_hint", 512))
        while tile_b > 8 and _estimate_vmem(tile_b, IN, tn, n_out, HID_P,
                                            csize, xsize, osize) > budget:
            tile_b //= 2
    tile_b = max(8, _round_up(min(int(tile_b), _round_up(B, 8)), 8))

    n_b = pl.cdiv(B, tile_b)
    if n_b > 1 and n_b % 2:       # even step count -> balanced megacore split
        n_b += 1
    B_pad = n_b * tile_b
    xk = jnp.pad(x, ((0, B_pad - B), (0, 0))) if B_pad != B else x

    est = _estimate_vmem(tile_b, IN, tn, n_out, HID_P, csize, xsize, osize)
    vmem_limit = int(min(budget, max(16 * 2**20, est + est // 4 + (2 << 20))))

    flops = (2 * B_pad * IN * HID_P                    # selector hidden (once per row)
             + 2 * B_pad * (IN + HID_P) * 2 * OUT_P    # main + gate matmuls
             + 6 * B_pad * OUT_P)                      # epilogue
    bytes_accessed = int(xk.size * xsize
                         + n_b * (prep["w_cb"].size + prep["w2_cb"].size) * csize
                         + prep["w1"].size * csize
                         + B_pad * OUT_P * osize)

    approx_recip = cdtype != jnp.float32
    kernel = functools.partial(_adaptive_mwl_kernel, tn=tn, approx_recip=approx_recip)

    def call(single_buffer_invariant):
        inv = 1 if single_buffer_invariant else None              # resident w1/b1
        wmode = 1 if (single_buffer_invariant and n_out == 1) else None
        grid_spec = pltpu.PrefetchScalarGridSpec(
            num_scalar_prefetch=0,
            grid=(n_b, n_out),
            in_specs=[
                _spec((tile_b, IN), lambda i, j: (i, 0)),                 # x tile
                _spec((IN, HID_P), lambda i, j: (0, 0), inv),             # w1 (resident)
                _spec((1, HID_P), lambda i, j: (0, 0), inv),              # b1
                _spec((IN, 2 * tn), lambda i, j: (0, j), wmode),          # w_cb tile
                _spec((1, 2 * tn), lambda i, j: (0, j), wmode),           # b_cb tile
                _spec((HID_P, 2 * tn), lambda i, j: (0, j), wmode),       # w2_cb tile
                _spec((1, 2 * tn), lambda i, j: (0, j), wmode),           # b2_cb tile
            ],
            out_specs=pl.BlockSpec((tile_b, tn), lambda i, j: (i, j)),
            scratch_shapes=[pltpu.VMEM((tile_b, HID_P), cdtype)],
        )
        return pl.pallas_call(
            kernel,
            out_shape=jax.ShapeDtypeStruct((B_pad, OUT_P), out_dtype),
            grid_spec=grid_spec,
            compiler_params=pltpu.CompilerParams(
                dimension_semantics=("parallel", "arbitrary"),
                vmem_limit_bytes=vmem_limit),
            cost_estimate=pl.CostEstimate(
                flops=flops,
                transcendentals=2 * B_pad * OUT_P,
                bytes_accessed=bytes_accessed),
        )(xk, prep["w1"], prep["b1"], prep["w_cb"], prep["b_cb"],
          prep["w2_cb"], prep["b2_cb"])

    try:
        out = call(True)
    except Exception:
        # Fallback for JAX versions where pipeline_mode=pl.Buffered(1) is rejected.
        out = call(False)

    return out[:B, :OUT]


def init_params(key, in_features, out_features, hidden=128):
    ks = jax.random.split(key, 6)
    return {
        "color_w":  jax.random.normal(ks[0], (out_features, in_features), jnp.float32) * 0.01,
        "bright_w": jax.random.normal(ks[1], (out_features, in_features), jnp.float32) * 0.01,
        "color_b":  jnp.zeros((out_features,), jnp.float32),
        "bright_b": jnp.zeros((out_features,), jnp.float32),
        # selector: Linear(in, 128) -> ReLU -> Linear(128, 2*out)
        "sel_w1": jax.random.normal(ks[2], (hidden, in_features), jnp.float32)
                  * (1.0 / jnp.sqrt(in_features)),
        "sel_b1": jax.random.normal(ks[3], (hidden,), jnp.float32) * 0.01,
        "sel_w2": jax.random.normal(ks[4], (2 * out_features, hidden), jnp.float32)
                  * (1.0 / jnp.sqrt(hidden)),
        "sel_b2": jax.random.normal(ks[5], (2 * out_features,), jnp.float32) * 0.01,
    }


def reference_forward(x, p):
    """Pure-JAX reference matching the PyTorch forward exactly (relu branch)."""
    color = jnp.maximum(x @ p["color_w"].T + p["color_b"], 0.0)
    bright = jnp.maximum(x @ p["bright_w"].T + p["bright_b"], 0.0)
    h = jnp.maximum(x @ p["sel_w1"].T + p["sel_b1"], 0.0)
    sel = h @ p["sel_w2"].T + p["sel_b2"]
    sel = sel.reshape(-1, p["color_w"].shape[0], 2)
    w = jax.nn.softmax(sel, axis=-1)
    return w[..., 0] * color + w[..., 1] * bright


if __name__ == "__main__":
    B, IN, OUT = 64, 32, 32
    key = jax.random.PRNGKey(0)
    kx, kp = jax.random.split(key)
    x = jax.random.normal(kx, (B, IN), jnp.float32)
    params = init_params(kp, IN, OUT)
    ref = reference_forward(x, params)

    # Exact-math path (f32 weights, exact reciprocal) -> tight tolerance.
    # tile_b=16 exercises a multi-step batch grid (4, 1).
    prep32 = prepare_params(params, compute_dtype=jnp.float32)
    out32 = jax.block_until_ready(adaptive_multi_weight_linear(x, prep32, tile_b=16))
    assert out32.shape == (B, OUT)
    assert jnp.allclose(out32, ref, atol=1e-5, rtol=1e-5), (
        f"f32 max abs err {jnp.max(jnp.abs(out32 - ref))}")

    # bf16 MXU path (production config, auto tile_b, approx recip) -> relaxed tol.
    prep16 = prepare_params(params, compute_dtype=jnp.bfloat16)
    out16 = jax.block_until_ready(adaptive_multi_weight_linear(x, prep16))
    assert out16.shape == (B, OUT)
    assert jnp.allclose(out16, ref, atol=2e-2, rtol=2e-2), (
        f"bf16 max abs err {jnp.max(jnp.abs(out16 - ref))}")

    print("KERNEL_OK")
</pallas_src>

<mosaic_0001>
module attributes {stable_mosaic.version = 11 : i64} {
  func.func @_adaptive_mwl_kernel(%arg0: i32, %arg1: i32, %arg2: memref<16x32xf32, #tpu.memory_space<vmem>>, %arg3: memref<32x128xf32, #tpu.memory_space<vmem>>, %arg4: memref<1x128xf32, #tpu.memory_space<vmem>>, %arg5: memref<32x256xf32, #tpu.memory_space<vmem>>, %arg6: memref<1x256xf32, #tpu.memory_space<vmem>>, %arg7: memref<128x256xf32, #tpu.memory_space<vmem>>, %arg8: memref<1x256xf32, #tpu.memory_space<vmem>>, %arg9: memref<16x128xf32, #tpu.memory_space<vmem>>, %arg10: memref<16x128xf32, #tpu.memory_space<vmem>>) attributes {dimension_semantics = [#tpu.dimension_semantics<parallel>, #tpu.dimension_semantics<arbitrary>], iteration_bounds = array<i64: 4, 1>, scalar_prefetch = 0 : i64, scratch_operands = 1 : i64, tpu.core_type = #tpu.core_type<tc>, window_params = [{transform_indices = @transform_0, window_bounds = array<i64: 16, 32>}, {pipeline_mode = #tpu.pipeline_mode<synchronous>, transform_indices = @transform_1, window_bounds = array<i64: 32, 128>}, {pipeline_mode = #tpu.pipeline_mode<synchronous>, transform_indices = @transform_2, window_bounds = array<i64: 1, 128>}, {pipeline_mode = #tpu.pipeline_mode<synchronous>, transform_indices = @transform_3, window_bounds = array<i64: 32, 256>}, {pipeline_mode = #tpu.pipeline_mode<synchronous>, transform_indices = @transform_4, window_bounds = array<i64: 1, 256>}, {pipeline_mode = #tpu.pipeline_mode<synchronous>, transform_indices = @transform_5, window_bounds = array<i64: 128, 256>}, {pipeline_mode = #tpu.pipeline_mode<synchronous>, transform_indices = @transform_6, window_bounds = array<i64: 1, 256>}, {transform_indices = @transform_7, window_bounds = array<i64: 16, 128>}]} {
    %c0 = arith.constant 0 : index
    %c0_0 = arith.constant 0 : index
    %0 = vector.load %arg2[%c0, %c0_0] : memref<16x32xf32, #tpu.memory_space<vmem>>, vector<16x32xf32>
    %c0_i32 = arith.constant 0 : i32
    %1 = arith.cmpi eq, %arg1, %c0_i32 : i32
    %2 = arith.extui %1 : i1 to i32
    %c0_i32_1 = arith.constant 0 : i32
    %3 = arith.cmpi ne, %2, %c0_i32_1 : i32
    scf.if %3 {
      %c0_17 = arith.constant 0 : index
      %c0_18 = arith.constant 0 : index
      %30 = vector.load %arg3[%c0_17, %c0_18] : memref<32x128xf32, #tpu.memory_space<vmem>>, vector<32x128xf32>
      %cst_19 = arith.constant dense<0.000000e+00> : vector<16x128xf32>
      %31 = tpu.matmul %0, %30, %cst_19 {dimension_numbers = #tpu.dot_dimension_numbers<[1], [0], [0], [1], [0, 0, 1, 1], [], []>} : vector<16x32xf32>, vector<32x128xf32>, vector<16x128xf32> -> vector<16x128xf32>
      %c0_20 = arith.constant 0 : index
      %c0_21 = arith.constant 0 : index
      %32 = vector.load %arg4[%c0_20, %c0_21] : memref<1x128xf32, #tpu.memory_space<vmem>>, vector<1x128xf32>
      %33 = vector.broadcast %32 : vector<1x128xf32> to vector<16x128xf32>
      %34 = arith.addf %31, %33 : vector<16x128xf32>
      %cst_22 = arith.constant 0.000000e+00 : f32
      %35 = vector.broadcast %cst_22 : f32 to vector<16x128xf32>
      %36 = arith.maximumf %34, %35 : vector<16x128xf32>
      %c0_23 = arith.constant 0 : index
      %c0_24 = arith.constant 0 : index
      %37 = vector.load %arg10[%c0_23, %c0_24] : memref<16x128xf32, #tpu.memory_space<vmem>>, vector<16x128xf32>
      tpu.vector_store %arg10[%c0_23, %c0_24], %36 {strides = array<i32>} : memref<16x128xf32, #tpu.memory_space<vmem>>, vector<16x128xf32>,
    } else {
    }
    %c0_2 = arith.constant 0 : index
    %c0_3 = arith.constant 0 : index
    %4 = vector.load %arg5[%c0_2, %c0_3] : memref<32x256xf32, #tpu.memory_space<vmem>>, vector<32x256xf32>
    %cst = arith.constant dense<0.000000e+00> : vector<16x256xf32>
    %5 = tpu.matmul %0, %4, %cst {dimension_numbers = #tpu.dot_dimension_numbers<[1], [0], [0], [1], [0, 0, 1, 1], [], []>} : vector<16x32xf32>, vector<32x256xf32>, vector<16x256xf32> -> vector<16x256xf32>
    %c0_4 = arith.constant 0 : index
    %c0_5 = arith.constant 0 : index
    %6 = vector.load %arg6[%c0_4, %c0_5] : memref<1x256xf32, #tpu.memory_space<vmem>>, vector<1x256xf32>
    %7 = vector.broadcast %6 : vector<1x256xf32> to vector<16x256xf32>
    %8 = arith.addf %5, %7 : vector<16x256xf32>
    %cst_6 = arith.constant 0.000000e+00 : f32
    %9 = vector.broadcast %cst_6 : f32 to vector<16x256xf32>
    %10 = arith.maximumf %8, %9 : vector<16x256xf32>
    %11 = vector.extract_strided_slice %10 {offsets = [0, 0], sizes = [16, 128], strides = [1, 1]} : vector<16x256xf32> to vector<16x128xf32>
    %12 = vector.extract_strided_slice %10 {offsets = [0, 128], sizes = [16, 128], strides = [1, 1]} : vector<16x256xf32> to vector<16x128xf32>
    %c0_7 = arith.constant 0 : index
    %c0_8 = arith.constant 0 : index
    %13 = vector.load %arg10[%c0_7, %c0_8] : memref<16x128xf32, #tpu.memory_space<vmem>>, vector<16x128xf32>
    %c0_9 = arith.constant 0 : index
    %c0_10 = arith.constant 0 : index
    %14 = vector.load %arg7[%c0_9, %c0_10] : memref<128x256xf32, #tpu.memory_space<vmem>>, vector<128x256xf32>
    %cst_11 = arith.constant dense<0.000000e+00> : vector<16x256xf32>
    %15 = tpu.matmul %13, %14, %cst_11 {dimension_numbers = #tpu.dot_dimension_numbers<[1], [0], [0], [1], [0, 0, 1, 1], [], []>} : vector<16x128xf32>, vector<128x256xf32>, vector<16x256xf32> -> vector<16x256xf32>
    %c0_12 = arith.constant 0 : index
    %c0_13 = arith.constant 0 : index
    %16 = vector.load %arg8[%c0_12, %c0_13] : memref<1x256xf32, #tpu.memory_space<vmem>>, vector<1x256xf32>
    %17 = vector.broadcast %16 : vector<1x256xf32> to vector<16x256xf32>
    %18 = arith.addf %15, %17 : vector<16x256xf32>
    %19 = vector.extract_strided_slice %18 {offsets = [0, 128], sizes = [16, 128], strides = [1, 1]} : vector<16x256xf32> to vector<16x128xf32>
    %20 = vector.extract_strided_slice %18 {offsets = [0, 0], sizes = [16, 128], strides = [1, 1]} : vector<16x256xf32> to vector<16x128xf32>
    %21 = arith.subf %19, %20 : vector<16x128xf32>
    %22 = math.exp %21 : vector<16x128xf32>
    %cst_14 = arith.constant 1.000000e+00 : f32
    %23 = vector.broadcast %cst_14 : f32 to vector<16x128xf32>
    %24 = arith.addf %23, %22 : vector<16x128xf32>
    %25 = tpu.reciprocal %24 : vector<16x128xf32> -> vector<16x128xf32>
    %26 = arith.subf %11, %12 : vector<16x128xf32>
    %27 = arith.mulf %25, %26 : vector<16x128xf32>
    %28 = arith.addf %12, %27 : vector<16x128xf32>
    %c0_15 = arith.constant 0 : index
    %c0_16 = arith.constant 0 : index
    %29 = vector.load %arg9[%c0_15, %c0_16] : memref<16x128xf32, #tpu.memory_space<vmem>>, vector<16x128xf32>
    tpu.vector_store %arg9[%c0_15, %c0_16], %28 {strides = array<i32>} : memref<16x128xf32, #tpu.memory_space<vmem>>, vector<16x128xf32>,
    return
  }
  func.func @transform_0(%arg0: i32, %arg1: i32) -> (i32, i32) {
    %c0_i32 = arith.constant 0 : i32
    %c0_i32_0 = arith.constant 0 : i32
    return %arg0, %c0_i32 : i32, i32
  }
  func.func @transform_1(%arg0: i32, %arg1: i32) -> (i32, i32) {
    %c0_i32 = arith.constant 0 : i32
    %c0_i32_0 = arith.constant 0 : i32
    %c0_i32_1 = arith.constant 0 : i32
    return %c0_i32, %c0_i32_0 : i32, i32
  }
  func.func @transform_2(%arg0: i32, %arg1: i32) -> (i32, i32) {
    %c0_i32 = arith.constant 0 : i32
    %c0_i32_0 = arith.constant 0 : i32
    %c0_i32_1 = arith.constant 0 : i32
    return %c0_i32, %c0_i32_0 : i32, i32
  }
  func.func @transform_3(%arg0: i32, %arg1: i32) -> (i32, i32) {
    %c0_i32 = arith.constant 0 : i32
    %c0_i32_0 = arith.constant 0 : i32
    return %c0_i32, %arg1 : i32, i32
  }
  func.func @transform_4(%arg0: i32, %arg1: i32) -> (i32, i32) {
    %c0_i32 = arith.constant 0 : i32
    %c0_i32_0 = arith.constant 0 : i32
    return %c0_i32, %arg1 : i32, i32
  }
  func.func @transform_5(%arg0: i32, %arg1: i32) -> (i32, i32) {
    %c0_i32 = arith.constant 0 : i32
    %c0_i32_0 = arith.constant 0 : i32
    return %c0_i32, %arg1 : i32, i32
  }
  func.func @transform_6(%arg0: i32, %arg1: i32) -> (i32, i32) {
    %c0_i32 = arith.constant 0 : i32
    %c0_i32_0 = arith.constant 0 : i32
    return %c0_i32, %arg1 : i32, i32
  }
  func.func @transform_7(%arg0: i32, %arg1: i32) -> (i32, i32) {
    %c0_i32 = arith.constant 0 : i32
    return %arg0, %arg1 : i32, i32
  }
}

module attributes {stable_mosaic.version = 11 : i64} {
  func.func @_adaptive_mwl_kernel(%arg0: i32, %arg1: i32, %arg2: memref<16x32xf32, #tpu.memory_space<vmem>>, %arg3: memref<32x128xf32, #tpu.memory_space<vmem>>, %arg4: memref<1x128xf32, #tpu.memory_space<vmem>>, %arg5: memref<32x256xf32, #tpu.memory_space<vmem>>, %arg6: memref<1x256xf32, #tpu.memory_space<vmem>>, %arg7: memref<128x256xf32, #tpu.memory_space<vmem>>, %arg8: memref<1x256xf32, #tpu.memory_space<vmem>>, %arg9: memref<16x128xf32, #tpu.memory_space<vmem>>, %arg10: memref<16x128xf32, #tpu.memory_space<vmem>>) attributes {dimension_semantics = [#tpu.dimension_semantics<parallel>, #tpu.dimension_semantics<arbitrary>], iteration_bounds = array<i64: 4, 1>, scalar_prefetch = 0 : i64, scratch_operands = 1 : i64, tpu.core_type = #tpu.core_type<tc>, window_params = [{transform_indices = @transform_0, window_bounds = array<i64: 16, 32>}, {pipeline_mode = #tpu.pipeline_mode<synchronous>, transform_indices = @transform_1, window_bounds = array<i64: 32, 128>}, {pipeline_mode = #tpu.pipeline_mode<synchronous>, transform_indices = @transform_2, window_bounds = array<i64: 1, 128>}, {transform_indices = @transform_3, window_bounds = array<i64: 32, 256>}, {transform_indices = @transform_4, window_bounds = array<i64: 1, 256>}, {transform_indices = @transform_5, window_bounds = array<i64: 128, 256>}, {transform_indices = @transform_6, window_bounds = array<i64: 1, 256>}, {transform_indices = @transform_7, window_bounds = array<i64: 16, 128>}]} {
    %c0 = arith.constant 0 : index
    %c0_0 = arith.constant 0 : index
    %0 = vector.load %arg2[%c0, %c0_0] : memref<16x32xf32, #tpu.memory_space<vmem>>, vector<16x32xf32>
    %c0_i32 = arith.constant 0 : i32
    %1 = arith.cmpi eq, %arg1, %c0_i32 : i32
    %2 = arith.extui %1 : i1 to i32
    %c0_i32_1 = arith.constant 0 : i32
    %3 = arith.cmpi ne, %2, %c0_i32_1 : i32
    scf.if %3 {
      %c0_17 = arith.constant 0 : index
      %c0_18 = arith.constant 0 : index
      %30 = vector.load %arg3[%c0_17, %c0_18] : memref<32x128xf32, #tpu.memory_space<vmem>>, vector<32x128xf32>
      %cst_19 = arith.constant dense<0.000000e+00> : vector<16x128xf32>
      %31 = tpu.matmul %0, %30, %cst_19 {dimension_numbers = #tpu.dot_dimension_numbers<[1], [0], [0], [1], [0, 0, 1, 1], [], []>} : vector<16x32xf32>, vector<32x128xf32>, vector<16x128xf32> -> vector<16x128xf32>
      %c0_20 = arith.constant 0 : index
      %c0_21 = arith.constant 0 : index
      %32 = vector.load %arg4[%c0_20, %c0_21] : memref<1x128xf32, #tpu.memory_space<vmem>>, vector<1x128xf32>
      %33 = vector.broadcast %32 : vector<1x128xf32> to vector<16x128xf32>
      %34 = arith.addf %31, %33 : vector<16x128xf32>
      %cst_22 = arith.constant 0.000000e+00 : f32
      %35 = vector.broadcast %cst_22 : f32 to vector<16x128xf32>
      %36 = arith.maximumf %34, %35 : vector<16x128xf32>
      %c0_23 = arith.constant 0 : index
      %c0_24 = arith.constant 0 : index
      %37 = vector.load %arg10[%c0_23, %c0_24] : memref<16x128xf32, #tpu.memory_space<vmem>>, vector<16x128xf32>
      tpu.vector_store %arg10[%c0_23, %c0_24], %36 {strides = array<i32>} : memref<16x128xf32, #tpu.memory_space<vmem>>, vector<16x128xf32>,
    } else {
    }
    %c0_2 = arith.constant 0 : index
    %c0_3 = arith.constant 0 : index
    %4 = vector.load %arg5[%c0_2, %c0_3] : memref<32x256xf32, #tpu.memory_space<vmem>>, vector<32x256xf32>
    %cst = arith.constant dense<0.000000e+00> : vector<16x256xf32>
    %5 = tpu.matmul %0, %4, %cst {dimension_numbers = #tpu.dot_dimension_numbers<[1], [0], [0], [1], [0, 0, 1, 1], [], []>} : vector<16x32xf32>, vector<32x256xf32>, vector<16x256xf32> -> vector<16x256xf32>
    %c0_4 = arith.constant 0 : index
    %c0_5 = arith.constant 0 : index
    %6 = vector.load %arg6[%c0_4, %c0_5] : memref<1x256xf32, #tpu.memory_space<vmem>>, vector<1x256xf32>
    %7 = vector.broadcast %6 : vector<1x256xf32> to vector<16x256xf32>
    %8 = arith.addf %5, %7 : vector<16x256xf32>
    %cst_6 = arith.constant 0.000000e+00 : f32
    %9 = vector.broadcast %cst_6 : f32 to vector<16x256xf32>
    %10 = arith.maximumf %8, %9 : vector<16x256xf32>
    %11 = vector.extract_strided_slice %10 {offsets = [0, 0], sizes = [16, 128], strides = [1, 1]} : vector<16x256xf32> to vector<16x128xf32>
    %12 = vector.extract_strided_slice %10 {offsets = [0, 128], sizes = [16, 128], strides = [1, 1]} : vector<16x256xf32> to vector<16x128xf32>
    %c0_7 = arith.constant 0 : index
    %c0_8 = arith.constant 0 : index
    %13 = vector.load %arg10[%c0_7, %c0_8] : memref<16x128xf32, #tpu.memory_space<vmem>>, vector<16x128xf32>
    %c0_9 = arith.constant 0 : index
    %c0_10 = arith.constant 0 : index
    %14 = vector.load %arg7[%c0_9, %c0_10] : memref<128x256xf32, #tpu.memory_space<vmem>>, vector<128x256xf32>
    %cst_11 = arith.constant dense<0.000000e+00> : vector<16x256xf32>
    %15 = tpu.matmul %13, %14, %cst_11 {dimension_numbers = #tpu.dot_dimension_numbers<[1], [0], [0], [1], [0, 0, 1, 1], [], []>} : vector<16x128xf32>, vector<128x256xf32>, vector<16x256xf32> -> vector<16x256xf32>
    %c0_12 = arith.constant 0 : index
    %c0_13 = arith.constant 0 : index
    %16 = vector.load %arg8[%c0_12, %c0_13] : memref<1x256xf32, #tpu.memory_space<vmem>>, vector<1x256xf32>
    %17 = vector.broadcast %16 : vector<1x256xf32> to vector<16x256xf32>
    %18 = arith.addf %15, %17 : vector<16x256xf32>
    %19 = vector.extract_strided_slice %18 {offsets = [0, 128], sizes = [16, 128], strides = [1, 1]} : vector<16x256xf32> to vector<16x128xf32>
    %20 = vector.extract_strided_slice %18 {offsets = [0, 0], sizes = [16, 128], strides = [1, 1]} : vector<16x256xf32> to vector<16x128xf32>
    %21 = arith.subf %19, %20 : vector<16x128xf32>
    %22 = math.exp %21 : vector<16x128xf32>
    %cst_14 = arith.constant 1.000000e+00 : f32
    %23 = vector.broadcast %cst_14 : f32 to vector<16x128xf32>
    %24 = arith.addf %23, %22 : vector<16x128xf32>
    %25 = tpu.reciprocal %24 : vector<16x128xf32> -> vector<16x128xf32>
    %26 = arith.subf %11, %12 : vector<16x128xf32>
    %27 = arith.mulf %25, %26 : vector<16x128xf32>
    %28 = arith.addf %12, %27 : vector<16x128xf32>
    %c0_15 = arith.constant 0 : index
    %c0_16 = arith.constant 0 : index
    %29 = vector.load %arg9[%c0_15, %c0_16] : memref<16x128xf32, #tpu.memory_space<vmem>>, vector<16x128xf32>
    tpu.vector_store %arg9[%c0_15, %c0_16], %28 {strides = array<i32>} : memref<16x128xf32, #tpu.memory_space<vmem>>, vector<16x128xf32>,
    return
  }
  func.func @transform_0(%arg0: i32, %arg1: i32) -> (i32, i32) {
    %c0_i32 = arith.constant 0 : i32
    %c0_i32_0 = arith.constant 0 : i32
    return %arg0, %c0_i32 : i32, i32
  }
  func.func @transform_1(%arg0: i32, %arg1: i32) -> (i32, i32) {
    %c0_i32 = arith.constant 0 : i32
    %c0_i32_0 = arith.constant 0 : i32
    %c0_i32_1 = arith.constant 0 : i32
    return %c0_i32, %c0_i32_0 : i32, i32
  }
  func.func @transform_2(%arg0: i32, %arg1: i32) -> (i32, i32) {
    %c0_i32 = arith.constant 0 : i32
    %c0_i32_0 = arith.constant 0 : i32
    %c0_i32_1 = arith.constant 0 : i32
    return %c0_i32, %c0_i32_0 : i32, i32
  }
  func.func @transform_3(%arg0: i32, %arg1: i32) -> (i32, i32) {
    %c0_i32 = arith.constant 0 : i32
    %c0_i32_0 = arith.constant 0 : i32
    return %c0_i32, %arg1 : i32, i32
  }
  func.func @transform_4(%arg0: i32, %arg1: i32) -> (i32, i32) {
    %c0_i32 = arith.constant 0 : i32
    %c0_i32_0 = arith.constant 0 : i32
    return %c0_i32, %arg1 : i32, i32
  }
  func.func @transform_5(%arg0: i32, %arg1: i32) -> (i32, i32) {
    %c0_i32 = arith.constant 0 : i32
    %c0_i32_0 = arith.constant 0 : i32
    return %c0_i32, %arg1 : i32, i32
  }
  func.func @transform_6(%arg0: i32, %arg1: i32) -> (i32, i32) {
    %c0_i32 = arith.constant 0 : i32
    %c0_i32_0 = arith.constant 0 : i32
    return %c0_i32, %arg1 : i32, i32
  }
  func.func @transform_7(%arg0: i32, %arg1: i32) -> (i32, i32) {
    %c0_i32 = arith.constant 0 : i32
    return %arg0, %arg1 : i32, i32
  }
}

</mosaic_0001>

<bundles_post_ra>
// kernel: tpu_custom_call.1
= control target key start
LH: loop header
LB: loop body
LE: loop exit
PB: predicated region body
PF: predicated region fallthrough
CT: control target
= control target key end

     0   :  { %12 = vsyncpa [#allocation4], 0  ;;  %s1410_s0 = inlined_call_operand.vmem [shape: f32[64,32], index: 0, kind: input, shape index: {}]   ;;  %s1411_s1 = inlined_call_operand.vmem [shape: f32[32,128], index: 1, kind: input, shape index: {}]   ;;  %s1412_s2 = inlined_call_operand.vmem [shape: f32[1,128], index: 2, kind: input, shape index: {}]   ;;  %s1413_s3 = inlined_call_operand.vmem [shape: f32[32,256], index: 3, kind: input, shape index: {}]   ;;  %s1414_s4 = inlined_call_operand.vmem [shape: f32[1,256], index: 4, kind: input, shape index: {}]   ;;  %s1415_s5 = inlined_call_operand.hbm [shape: f32[128,256], index: 5, kind: input, shape index: {}]   ;;  %s1416_s6 = inlined_call_operand.vmem [shape: f32[1,256], index: 6, kind: input, shape index: {}]   ;;  %s1417_s7 = inlined_call_operand.hbm [shape: f32[64,128], index: 7, kind: output, shape index: {}]  }
   0x1   :  { %13 = vsyncpa [#allocation5], 0 }
   0x2   :  { %15 = vsyncpa [#allocation5 + $0x1], 0  ;;  %s1197_s24 = smov 0   ;;  %s1199_s25 = smov 0  }
   0x3   :  { %s1201_s26 = smov 0   ;;  %s1203_s27 = smov 0  }
   0x4   :  { %s1205_s28 = smov 0   ;;  %s1207_s29 = smov 0  }
   0x5 LB: > { %s870_s30 = sadd.s32 4294967295, %s1148_s29   ;;  %s871_s8 = sadd.s32 4294967294, %s1148_s29   ;;  %s1148_s29 = sphi %s1207_s29, %s21_s29   ;;  %s1144_s28 = sphi %s1205_s28, %s1435_s28   ;;  %s1140_s27 = sphi %s1203_s27, %s1434_s27   ;;  %s1136_s26 = sphi %s1201_s26, %s1433_s26   ;;  %s1132_s25 = sphi %s1199_s25, %s1432_s25   ;;  %s1128_s24 = sphi %s1197_s24, %s1431_s24  }
   0x6   : > { %s33_s9 = sadd.s32 1, %s1144_s28  ;;  %s214_s10 = sadd.s32 1, %s1136_s26 }
   0x7   : > { %p35_p0 = scmp.ge.s32.totalorder %s33_s9, 4  ;;  %p224_p1 = scmp.ne.s32.totalorder %s1136_s26, %s1132_s25 }
   0x8   : > { %p225_p2 = scmp.eq.s32.totalorder %s870_s30, 3  ;;  %p230_p3 = scmp.ne.s32.totalorder %s1132_s25, %s1128_s24 }
   0x9   : > { %s1437_s9 = smov (%p35_p0, %s33_s9), 0  ;;  %p231_p5 = scmp.eq.s32.totalorder %s871_s8, 3 }
   0xa   : > { %p1237_p4 = por %p225_p2, %p224_p1  ;;  %s209_s12 = ssub.s32 %s1144_s28, %s1437_s9 }
   0xb   : > { %p872_p6 = scmp.ge.s32.totalorder %s1148_s29, 1  ;;  %p212_p7 = scmp.eq.s32.totalorder %s209_s12, 0 }
   0xc   : > { %s1422_s11 = scalar_select %p1237_p4, 1, 0 }
   0xd   : > { %p1244_p8 = por %p231_p5, %p230_p3  ;;  %p238_p9 = scmp.lt.s32.totalorder %s1148_s29, 5 }
   0xe   : > { %s1250_s14 = scalar_select %p212_p7, %s1136_s26, %s214_s10  }
   0xf   : > { %s1423_s13 = scalar_select %p1244_p8, 1, 0 }
  0x10   : > { %p1252_p10 = pnand %p872_p6, %p238_p9  ;;  %p1256_p11 = scmp.eq.s32.totalorder %s870_s30, 0 }
  0x11   : > { %s1150_s17 = smov [#allocation3]   ;;  %s1038_s22 = scalar_lea.hbm %s1415_s5, 4096 }
  0x12   : > { %s1424_s15 = scalar_select %p1252_p10, 1, 0 }
  0x13   : > { %s1425_s16 = scalar_select %p1256_p11, 1, 0 }
  0x14   : > { %p965_p12 = pneg %p1252_p10  ;;  %s276_s18 = sshll.u32 %s1150_s17, 4  ;;  %s277_s18 = int_to_ptr.vmem [resolvable:$true] %s276_s18 }
  0x15   : > { %p1039_p0 = scmp.ne.s32.totalorder %s1415_s5, %s1038_s22  ;;  %p1045_p5 = scmp.lt.u32.totalorder %s1038_s22, %s1415_s5 }
  0x16   : > { %p1264_p13 = pnand %p1256_p11, %p965_p12 }
  0x18   : > { %p1040_p1 = pneg %p1264_p13 }
  0x1a   : > { %p1041_p2 = pnand %p1040_p1, %p1039_p0 }
  0x1c   : > { %p1042_p3 = pneg %p1041_p2 }
  0x1e   : > { %p1047_p6 = pnand %p1045_p5, %p1042_p3 }
  0x20   : > { %1050 = shalt.err (!%p1047_p6)
}
  0x21   : > { %s1051_s12 = scalar_lea.vmem %s277_s18, 4096  ;;  %p1059_p8 = scmp.lt.s32.totalorder %s277_s18, %s277_s18 }
  0x22   : > { %p1052_p7 = scmp.ne.s32.totalorder %s277_s18, %s1051_s12  ;;  %p1060_p4 = scmp.lt.s32.totalorder %s1051_s12, %s1051_s12 }
  0x24   : > { %p1054_p9 = pnand %p1052_p7, %p1040_p1  ;;  %p1061_p11 = por %p1060_p4, %p1059_p8 }
  0x26   : > { %p1055_p12 = pneg %p1054_p9 }
  0x28   : > { %p1062_p10 = pnand %p1061_p11, %p1055_p12 }
  0x2a   : > { %1065 = shalt.err (!%p1062_p10)
}
  0x2b   : > { %s1151_s17 = smov 256   ;;  %s1152_s20 = smov 16  }
  0x2c   : > { %968 = dma.hbm_to_vmem [thread:$0]  (!%p1264_p13), %s1415_s5, 4096, %s277_s18, [#allocation4], %s1151_s17, %s1151_s17, %s1152_s20  }
  0x2d   : > { %p1427_p0 = scmp.ne.s32.totalorder %s1424_s15, 0 }
  0x2e   : > { %p1428_p2 = scmp.ne.s32.totalorder (!%p1427_p0), %s1425_s16, 0 }
  0x2f   : > { %309 = sbr.rel (%p1427_p0) target bundleno = 549 (0x225), region = 48 }
  0x36   : > { %1119 = dma.done.wait (%p1428_p2), [#allocation4], 4096  }
  0x37   : > { %1121 = vsyncadd (%p1428_p2), [#allocation4], 4294963200  ;;  %s881_s22 = sshll.u32 %s1140_s27, 1  ;;  %vm395_vm0 = vcmask 261120   ;;  %v384_v0 = vld [vmem:[%s1411_s1] sm:$0xff]  ;;  %v385_v1 = vld [vmem:[%s1411_s1 + $0x8] sm:$0xff] }
  0x38   : > { %p355_p4 = scmp.lt.s32.totalorder %s881_s22, 7  ;;  %v386_v2 = vld [vmem:[%s1411_s1 + $0x10] sm:$0xff]  ;;  %v911_v3 = vpack.c.bf16 %v385_v1, %v384_v0  ;;  %v387_v4 = vld [vmem:[%s1411_s1 + $0x18] sm:$0xff]  ;;  %v592_v7 = vld [vmem:[#allocation3 + $0x8] sm:$0xff]  ;;  %v1153_v56 = vmov 0.0   ;;  %s351_s16 = sand.u32 1, %s1132_s25  }
  0x39   : > { %v915_v6 = vpack.c.bf16 %v387_v4, %v386_v2  ;;  %v594_v8 = vld [vmem:[#allocation3 + $0x18] sm:$0xff]  ;;  %v591_v9 = vld [vmem:[#allocation3] sm:$0xff]  ;;  %v593_v11 = vld [vmem:[#allocation3 + $0x10] sm:$0xff]  ;;  %699 = vmatprep.mubr.f32.mxu0 %v1153_v56  ;;  %s880_s20 = sshll.u32 %s351_s16, 4  ;;  %p1429_p10 = scmp.ne.s32.totalorder %s1422_s11, 0 }
  0x3a   : > { %s1439_s22 = smov (!%p355_p4, %s881_s22), 7  ;;  %912 = vmatprep.subr.bf16.mxu1 %v911_v3  ;;  %v927_v10 = vpack.c.bf16 %v594_v8, %v592_v7  ;;  %v596_v12 = vld [vmem:[#allocation3 + $0x28] sm:$0xff]  ;;  %v598_v13 = vld [vmem:[#allocation3 + $0x38] sm:$0xff]  ;;  %v929_v14 = vpack.c.bf16 %v593_v11, %v591_v9  ;;  %v595_v16 = vld [vmem:[#allocation3 + $0x20] sm:$0xff]  ;;  %s353_s21 = scalar_lea.vmem [#allocation6], %s880_s20 }
  0x3b   : > { %s882_s30 = sshll.u32 %s1439_s22, 3  ;;  %914 = vmatpush3.bf16.msra.mxu1 %v911_v3  ;;  %v931_v15 = vpack.c.bf16 %v598_v13, %v596_v12  ;;  %v597_v17 = vld [vmem:[#allocation3 + $0x30] sm:$0xff]  ;;  %v600_v18 = vld [vmem:[#allocation3 + $0x48] sm:$0xff]  ;;  %v602_v19 = vld [vmem:[#allocation3 + $0x58] sm:$0xff]  ;;  %v491_v13 = vlaneseq  ;;  %s745_s23 = sshll.u32 %s353_s21, 4  ;;  %s1357_s23 = int_to_ptr.vmem [resolvable:$true] %s745_s23 }
  0x3c   : > { %s1294_s10 = scalar_lea.vmem %s1410_s0, %s882_s30  ;;  %916 = vmatprep.subr.bf16.mxu1 %v915_v6  ;;  %928 = vmatprep.subr.bf16.mxu0 %v927_v10  ;;  %v933_v20 = vpack.c.bf16 %v597_v17, %v595_v16  ;;  %v935_v21 = vpack.c.bf16 %v602_v19, %v600_v18  ;;  %v599_v22 = vld [vmem:[#allocation3 + $0x40] sm:$0xff]  ;;  %v601_v23 = vld [vmem:[#allocation3 + $0x50] sm:$0xff]  ;;  %v604_v25 = vld [vmem:[#allocation3 + $0x68] sm:$0xff]  ;;  %s893_s22 = sshll.u32 %s1140_s27, 8 }
  0x3d   : > { %v1309_v5 = vld [vmem:[%s1294_s10] sm:$0xff]  ;;  %930 = vmatpush1.bf16.msra.mxu0 %v929_v14  ;;  %v1314_v24 = vld [vmem:[%s1294_s10 + $0x8] sm:$0xff]  ;;  %v606_v26 = vld [vmem:[#allocation3 + $0x78] sm:$0xff]  ;;  %v937_v27 = vpack.c.bf16 %v601_v23, %v599_v22  ;;  %v492_v14 = vshrl.u32 %v491_v13, 7  ;;  %s1362_s19 = scalar_lea.hbm %s1417_s7, %s893_s22  ;;  %s1364_s10 = scalar_lea.sflag [#allocation5], %s351_s16 }
  0x3e   : > { %908 = vmatprep.mubr.msk.f32.mxu1 %vm395_vm0, %v1309_v5  ;;  %932 = vmatprep.subr.bf16.mxu0 %v931_v15  ;;  %v939_v28 = vpack.c.bf16 %v606_v26, %v604_v25  ;;  %v603_v29 = vld [vmem:[#allocation3 + $0x60] sm:$0xff]  ;;  %v605_v30 = vld [vmem:[#allocation3 + $0x70] sm:$0xff]  ;;  %v608_v31 = vld [vmem:[#allocation3 + $0x88] sm:$0xff]  ;;  %s1066_s15 = scalar_lea.vmem %s1357_s23, 256  ;;  %s1154_s27 = smov [#allocation6]  }
  0x3f   : > { %918 = vmatpush3.bf16.msra.mxu1 %v915_v6  ;;  %v610_v32 = vld [vmem:[#allocation3 + $0x98] sm:$0xff]  ;;  %v941_v33 = vpack.c.bf16 %v605_v30, %v603_v29  ;;  %v607_v35 = vld [vmem:[#allocation3 + $0x80] sm:$0xff]  ;;  %v609_v36 = vld [vmem:[#allocation3 + $0x90] sm:$0xff]  ;;  %v497_v15 = vsub.s32 1, %v492_v14  ;;  %p1067_p8 = scmp.ne.s32.totalorder %s1357_s23, %s1066_s15  ;;  %s1070_s18 = sshll.u32 %s1154_s27, 4  ;;  %s1071_s18 = int_to_ptr.vmem [resolvable:$false] %s1070_s18 }
  0x40   : > { %v943_v34 = vpack.c.bf16 %v610_v32, %v608_v31  ;;  %v612_v37 = vld [vmem:[#allocation3 + $0xa8] sm:$0xff]  ;;  %v614_v38 = vld [vmem:[#allocation3 + $0xb8] sm:$0xff]  ;;  %v945_v39 = vpack.c.bf16 %v609_v36, %v607_v35  ;;  %v611_v41 = vld [vmem:[#allocation3 + $0xa0] sm:$0xff]  ;;  %s1072_s12 = scalar_lea.vmem %s1071_s18, 512  ;;  %p1073_p1 = scmp.lt.s32.totalorder %s1357_s23, %s1071_s18 }
  0x41   : > { %934 = vmatpush1.bf16.msra.mxu0 %v933_v20  ;;  %v947_v40 = vpack.c.bf16 %v614_v38, %v612_v37  ;;  %v613_v42 = vld [vmem:[#allocation3 + $0xb0] sm:$0xff]  ;;  %v616_v43 = vld [vmem:[#allocation3 + $0xc8] sm:$0xff]  ;;  %v618_v44 = vld [vmem:[#allocation3 + $0xd8] sm:$0xff]  ;;  %p1068_p11 = pnand %p1067_p8, %p1429_p10  ;;  %p1074_p3 = scmp.lt.s32.totalorder %s1072_s12, %s1066_s15 }
  0x42   : > { %909 = vmatmul.mubr.msk.f32.vlgmr.msra.gmra.mrb[0].mxu1 %vm395_vm0, %v1314_v24  ;;  %936 = vmatprep.subr.bf16.mxu0 %v935_v21  ;;  %v949_v45 = vpack.c.bf16 %v613_v42, %v611_v41  ;;  %v951_v46 = vpack.c.bf16 %v618_v44, %v616_v43  ;;  %v615_v47 = vld [vmem:[#allocation3 + $0xc0] sm:$0xff]  ;;  %v617_v48 = vld [vmem:[#allocation3 + $0xd0] sm:$0xff]  ;;  %v620_v50 = vld [vmem:[#allocation3 + $0xe8] sm:$0xff] }
  0x43   : > { %v953_v49 = vpack.c.bf16 %v617_v48, %v615_v47  ;;  %v622_v51 = vld [vmem:[#allocation3 + $0xf8] sm:$0xff]  ;;  %v619_v53 = vld [vmem:[#allocation3 + $0xe0] sm:$0xff]  ;;  %v621_v54 = vld [vmem:[#allocation3 + $0xf0] sm:$0xff]  ;;  %572 = vmatprep.mubr.f32.mxu1 %v1153_v56  ;;  %p1069_p13 = pneg %p1068_p11  ;;  %p1075_p5 = por %p1074_p3, %p1073_p1 }
  0x44   : > { %v955_v52 = vpack.c.bf16 %v622_v51, %v620_v50  ;;  %v957_v55 = vpack.c.bf16 %v621_v54, %v619_v53  ;;  %v482_v57 = vld [vmem:[%s1413_s3 + $0x8] sm:$0xff]  ;;  %v484_v58 = vld [vmem:[%s1413_s3 + $0x18] sm:$0xff]  ;;  %v481_v59 = vld [vmem:[%s1413_s3] sm:$0xff] }
  0x45   : > { %938 = vmatpush1.bf16.msra.mxu0 %v937_v27  ;;  %v919_v60 = vpack.c.bf16 %v484_v58, %v482_v57  ;;  %v483_v61 = vld [vmem:[%s1413_s3 + $0x10] sm:$0xff]  ;;  %v486_v62 = vld [vmem:[%s1413_s3 + $0x28] sm:$0xff]  ;;  %v488_v63 = vld [vmem:[%s1413_s3 + $0x38] sm:$0xff]  ;;  %p1076_p6 = pnand %p1075_p5, %p1069_p13 }
  0x46   : > { %940 = vmatprep.subr.bf16.mxu0 %v939_v28  ;;  %v921_v0 = vpack.c.bf16 %v483_v61, %v481_v59  ;;  %v923_v1 = vpack.c.bf16 %v488_v63, %v486_v62  ;;  %v485_v2 = vld [vmem:[%s1413_s3 + $0x20] sm:$0xff]  ;;  %v487_v3 = vld [vmem:[%s1413_s3 + $0x30] sm:$0xff] }
  0x47   : > { %920 = vmatprep.subr.bf16.mxu1 %v919_v60  ;;  %v925_v4 = vpack.c.bf16 %v487_v3, %v485_v2  ;;  %v883_v6 = vld [vmem:[%s1412_s2] ss:$0 sm:$0xff] }
  0x48   : > { %922 = vmatpush1.bf16.msra.mxu1 %v921_v0  ;;  %v489_v16 = vld [vmem:[%s1414_s4] sm:$0x3] }
  0x49   : > { %942 = vmatpush1.bf16.msra.mxu0 %v941_v33  ;;  %924 = vmatprep.subr.bf16.mxu1 %v923_v1  ;;  %v498_v19 = vrot.slane %v489_v16, %v497_v15  ;;  %v623_v33 = vld [vmem:[%s1416_s6] sm:$0x3] }
  0x4a   : > { %944 = vmatprep.subr.bf16.mxu0 %v943_v34  ;;  %v632_v35 = vrot.slane %v623_v33, %v497_v15 }
  0x4c   : > { %926 = vmatpush1.bf16.msra.mxu1 %v925_v4 }
  0x4d   : > { %946 = vmatpush1.bf16.msra.mxu0 %v945_v39 }
  0x4e   : > { %948 = vmatprep.subr.bf16.mxu0 %v947_v40 }
  0x4f   : > { %886 = vmatmul.mubr.msk.f32.vlgmr.msra.gmra.mrb[2].mxu1 %vm395_vm0, %v1309_v5  ;;  %v493_v5 = vsub.s32 0, %v492_v14 }
  0x50   : > { %578 = vmatprep.mubr.f32.mxu1 %v1153_v56 }
  0x51   : > { %950 = vmatpush1.bf16.msra.mxu0 %v949_v45  ;;  %v494_v17 = vrot.slane %v489_v16, %v493_v5  ;;  %v628_v34 = vrot.slane %v623_v33, %v493_v5 }
  0x52   : > { %952 = vmatprep.subr.bf16.mxu0 %v951_v46 }
  0x53   : > { %887 = vmatmul.mubr.msk.f32.gmra.mrb[4].mxu1 %vm395_vm0, %v1314_v24 }
  0x55   : > { %954 = vmatpush1.bf16.msra.mxu0 %v953_v49 }
  0x56   : > { %956 = vmatprep.subr.bf16.mxu0 %v955_v52 }
  0x59   : > { %958 = vmatpush1.bf16.msra.mxu0 %v957_v55 }
 0x115   : > { %v910_v7 = vpop.f32.mrb[0].mxu1 }
 0x116   : > { %v468_v8 = vpop.f32.mrb[1].mxu1  ;;  %v474_v10 = vadd.f32 %v910_v7, %v883_v6 }
 0x117   : > { %v469_v9 = vadd.f32 %v883_v6, %v468_v8 }
 0x118   : > { %v478_v12 = vmax.f32 %v474_v10, 0.0 }
 0x119   : > { %v477_v11 = vmax.f32 %v469_v9, 0.0 }
 0x11b   : > { %700 = vmatmul.mubr.f32.vlgmr.msra.gmra.mrb[0].mxu0 %v477_v11 }
 0x11c   : > { %705 = vmatprep.mubr.f32.mxu0 %v1153_v56 }
 0x11f   : > { %706 = vmatmul.mubr.f32.gmra.mrb[2].mxu0 %v478_v12 }
 0x122   : > { %v574_v18 = vpop.f32.mrb[2].mxu1 }
 0x123   : > { %v576_v20 = vpop.f32.mrb[3].mxu1  ;;  %v575_v21 = vadd.f32 %v574_v18, %v494_v17 }
 0x124   : > { %v577_v22 = vadd.f32 %v576_v20, %v498_v19 }
 0x125   : > { %v585_v23 = vmax.f32 %v575_v21, 0.0 }
 0x126   : > { %v586_v24 = vmax.f32 %v577_v22, 0.0  ;;  %v580_v25 = vpop.f32.mrb[4].mxu1 }
 0x127   : > { %v582_v26 = vpop.f32.mrb[5].mxu1  ;;  %v581_v28 = vadd.f32 %v580_v25, %v494_v17 }
 0x128   : > { %v722_v27 = vsub.f32 %v585_v23, %v586_v24  ;;  %v583_v29 = vadd.f32 %v582_v26, %v498_v19 }
 0x129   : > { %v587_v30 = vmax.f32 %v581_v28, 0.0 }
 0x12a   : > { %v588_v31 = vmax.f32 %v583_v29, 0.0 }
 0x12c   : > { %v723_v32 = vsub.f32 %v587_v30, %v588_v31 }
 0x1ee   : > { %v701_v36 = vpop.f32.mrb[0].mxu0 }
 0x1ef   : > { %v702_v37 = vadd.f32 %v701_v36, %v628_v34  ;;  %v703_v38 = vpop.f32.mrb[1].mxu0 }
 0x1f0   : > { %v704_v39 = vadd.f32 %v703_v38, %v632_v35 }
 0x1f2   : > { %v712_v40 = vsub.f32 %v704_v39, %v702_v37  ;;  %v707_v41 = vpop.f32.mrb[2].mxu0 }
 0x1f3   : > { %v708_v42 = vadd.f32 %v707_v41, %v628_v34  ;;  %v709_v43 = vpop.f32.mrb[3].mxu0 }
 0x1f4   : > { %v714_v44 = vmul.f32 1.442695, %v712_v40  ;;  %v710_v45 = vadd.f32 %v709_v43, %v632_v35 }
 0x1f6   : > { %1030 = vpow2.f32 %v714_v44  ;;  %v713_v46 = vsub.f32 %v710_v45, %v708_v42 }
 0x1f8   : > { %v716_v47 = vmul.f32 1.442695, %v713_v46 }
 0x1fa   : > { %1032 = vpow2.f32 %v716_v47 }
 0x200   : > { %v1031_v48 = vpop.eup %1030 }
 0x201   : > { %v718_v49 = vadd.f32 1.0, %v1031_v48 }
 0x203   : > { %1034 = vrcp.f32 %v718_v49 }
 0x204   : > { %v1033_v50 = vpop.eup %1032 }
 0x205   : > { %v719_v51 = vadd.f32 1.0, %v1033_v50 }
 0x207   : > { %1036 = vrcp.f32 %v719_v51 }
 0x20d   : > { %v1035_v52 = vpop.eup %1034 }
 0x20e   : > { %v724_v53 = vmul.f32 %v1035_v52, %v722_v27 }
 0x210   : > { %v726_v54 = vadd.f32 %v724_v53, %v586_v24 }
 0x211   : > { %v1037_v55 = vpop.eup %1036 }
 0x212   : > { %728 = vst [vmem:[%s353_s21] sm:$0xff] %v726_v54  ;;  %v725_v56 = vmul.f32 %v1037_v55, %v723_v32 }
 0x214   : > { %v727_v57 = vadd.f32 %v725_v56, %v588_v31 }
 0x216   : > { %729 = vst [vmem:[%s353_s21 + $0x8] sm:$0xff] %v727_v57 }
 0x217   : > { %1079 = shalt.err (!%p1076_p6)
}
 0x218   : > { %s1080_s17 = scalar_lea.hbm %s1362_s19, 256  ;;  %s1084_s21 = scalar_lea.hbm %s1417_s7, 1024 }
 0x219   : > { %p1081_p7 = scmp.ne.s32.totalorder %s1362_s19, %s1080_s17  ;;  %p1085_p0 = scmp.lt.u32.totalorder %s1362_s19, %s1417_s7 }
 0x21a   : > { %p1086_p2 = scmp.lt.u32.totalorder %s1084_s21, %s1080_s17  ;;  %p1088_p8 = scmp.lt.u32.totalorder %s1080_s17, %s1362_s19 }
 0x21b   : > { %p1082_p9 = pnand %p1081_p7, %p1429_p10 }
 0x21c   : > { %p1087_p4 = por %p1086_p2, %p1085_p0 }
 0x21d   : > { %p1083_p12 = pneg %p1082_p9 }
 0x21e   : > { %p1089_p11 = por %p1088_p8, %p1087_p4 }
 0x220   : > { %p1090_p13 = pnand %p1089_p11, %p1083_p12 }
 0x222   : > { %1093 = shalt.err (!%p1090_p13)
}
 0x223   : > { %s1155_s8 = smov 128   ;;  %s1156_s15 = smov 8  }
 0x224   : > { %963 = dma.vmem_to_hbm [thread:$0]  (%p1429_p10), %s1357_s23, 256, %s1362_s19, %s1364_s10, %s1155_s8, %s1155_s8, %s1156_s15  }
 0x225 PF: > { %p975_p1 = scmp.ge.s32.totalorder %s1148_s29, 2  ;;  %s760_s27 = sand.u32 1, %s1128_s24  }
 0x226   : > { %p1430_p3 = scmp.ne.s32.totalorder %s1423_s13, 0  ;;  %s761_s18 = scalar_lea.sflag [#allocation5], %s760_s27 }
 0x228   : > { %p970_p5 = pnand %p975_p1, %p1430_p3 }
 0x22a   : > { %1123 = dma.done.wait (!%p970_p5), %s761_s18, 256  }
 0x22b   : > { %1125 = vsyncadd (!%p970_p5), %s761_s18, 4294967040  ;;  %s21_s29 = sadd.s32 1, %s1148_s29   ;;  %s1431_s24 = smov %s1132_s25 }
 0x22c   : > { %p18_p6 = scmp.ge.s32.totalorder %s21_s29, 6   ;;  %s1432_s25 = smov %s1136_s26 }
 0x22d   : > { %s1433_s26 = smov %s1250_s14  ;;  %s1434_s27 = smov %s1144_s28 }
 0x22e   : > { %s1435_s28 = smov %s1437_s9  ;;  %20 = sbr.rel (!%p18_p6) target bundleno = 5 (0x5), region = 102 }
 0x235   :  { %766 = vsyncpa [#allocation4], 1 }
 0x236   :  { %768 = vsyncpa [#allocation4 + $0x1], 1 }
 0x237   :  { %769 = vsyncpa [#allocation5], 1 }
 0x238   :  { %771 = vsyncpa [#allocation5 + $0x1], 1 }

// kernel: tpu_custom_call.1
= control target key start
LH: loop header
LB: loop body
LE: loop exit
PB: predicated region body
PF: predicated region fallthrough
CT: control target
= control target key end

     0   :  { %12 = vsyncpa [#allocation4], 0  ;;  %s1410_s0 = inlined_call_operand.vmem [shape: f32[64,32], index: 0, kind: input, shape index: {}]   ;;  %s1411_s1 = inlined_call_operand.vmem [shape: f32[32,128], index: 1, kind: input, shape index: {}]   ;;  %s1412_s2 = inlined_call_operand.vmem [shape: f32[1,128], index: 2, kind: input, shape index: {}]   ;;  %s1413_s3 = inlined_call_operand.vmem [shape: f32[32,256], index: 3, kind: input, shape index: {}]   ;;  %s1414_s4 = inlined_call_operand.vmem [shape: f32[1,256], index: 4, kind: input, shape index: {}]   ;;  %s1415_s5 = inlined_call_operand.hbm [shape: f32[128,256], index: 5, kind: input, shape index: {}]   ;;  %s1416_s6 = inlined_call_operand.vmem [shape: f32[1,256], index: 6, kind: input, shape index: {}]   ;;  %s1417_s7 = inlined_call_operand.hbm [shape: f32[64,128], index: 7, kind: output, shape index: {}]  }
   0x1   :  { %13 = vsyncpa [#allocation5], 0 }
   0x2   :  { %15 = vsyncpa [#allocation5 + $0x1], 0  ;;  %s1197_s24 = smov 0   ;;  %s1199_s25 = smov 0  }
   0x3   :  { %s1201_s26 = smov 0   ;;  %s1203_s27 = smov 0  }
   0x4   :  { %s1205_s28 = smov 0   ;;  %s1207_s29 = smov 0  }
   0x5 LB: > { %s870_s30 = sadd.s32 4294967295, %s1148_s29   ;;  %s871_s8 = sadd.s32 4294967294, %s1148_s29   ;;  %s1148_s29 = sphi %s1207_s29, %s21_s29   ;;  %s1144_s28 = sphi %s1205_s28, %s1435_s28   ;;  %s1140_s27 = sphi %s1203_s27, %s1434_s27   ;;  %s1136_s26 = sphi %s1201_s26, %s1433_s26   ;;  %s1132_s25 = sphi %s1199_s25, %s1432_s25   ;;  %s1128_s24 = sphi %s1197_s24, %s1431_s24  }
   0x6   : > { %s33_s9 = sadd.s32 1, %s1144_s28  ;;  %s214_s10 = sadd.s32 1, %s1136_s26 }
   0x7   : > { %p35_p0 = scmp.ge.s32.totalorder %s33_s9, 4  ;;  %p224_p1 = scmp.ne.s32.totalorder %s1136_s26, %s1132_s25 }
   0x8   : > { %p225_p2 = scmp.eq.s32.totalorder %s870_s30, 3  ;;  %p230_p3 = scmp.ne.s32.totalorder %s1132_s25, %s1128_s24 }
   0x9   : > { %s1437_s9 = smov (%p35_p0, %s33_s9), 0  ;;  %p231_p5 = scmp.eq.s32.totalorder %s871_s8, 3 }
   0xa   : > { %p1237_p4 = por %p225_p2, %p224_p1  ;;  %s209_s12 = ssub.s32 %s1144_s28, %s1437_s9 }
   0xb   : > { %p872_p6 = scmp.ge.s32.totalorder %s1148_s29, 1  ;;  %p212_p7 = scmp.eq.s32.totalorder %s209_s12, 0 }
   0xc   : > { %s1422_s11 = scalar_select %p1237_p4, 1, 0 }
   0xd   : > { %p1244_p8 = por %p231_p5, %p230_p3  ;;  %p238_p9 = scmp.lt.s32.totalorder %s1148_s29, 5 }
   0xe   : > { %s1250_s14 = scalar_select %p212_p7, %s1136_s26, %s214_s10  }
   0xf   : > { %s1423_s13 = scalar_select %p1244_p8, 1, 0 }
  0x10   : > { %p1252_p10 = pnand %p872_p6, %p238_p9  ;;  %p1256_p11 = scmp.eq.s32.totalorder %s870_s30, 0 }
  0x11   : > { %s1150_s17 = smov [#allocation3]   ;;  %s1038_s22 = scalar_lea.hbm %s1415_s5, 4096 }
  0x12   : > { %s1424_s15 = scalar_select %p1252_p10, 1, 0 }
  0x13   : > { %s1425_s16 = scalar_select %p1256_p11, 1, 0 }
  0x14   : > { %p965_p12 = pneg %p1252_p10  ;;  %s276_s18 = sshll.u32 %s1150_s17, 4  ;;  %s277_s18 = int_to_ptr.vmem [resolvable:$true] %s276_s18 }
  0x15   : > { %p1039_p0 = scmp.ne.s32.totalorder %s1415_s5, %s1038_s22  ;;  %p1045_p5 = scmp.lt.u32.totalorder %s1038_s22, %s1415_s5 }
  0x16   : > { %p1264_p13 = pnand %p1256_p11, %p965_p12 }
  0x18   : > { %p1040_p1 = pneg %p1264_p13 }
  0x1a   : > { %p1041_p2 = pnand %p1040_p1, %p1039_p0 }
  0x1c   : > { %p1042_p3 = pneg %p1041_p2 }
  0x1e   : > { %p1047_p6 = pnand %p1045_p5, %p1042_p3 }
  0x20   : > { %1050 = shalt.err (!%p1047_p6)
}
  0x21   : > { %s1051_s12 = scalar_lea.vmem %s277_s18, 4096  ;;  %p1059_p8 = scmp.lt.s32.totalorder %s277_s18, %s277_s18 }
  0x22   : > { %p1052_p7 = scmp.ne.s32.totalorder %s277_s18, %s1051_s12  ;;  %p1060_p4 = scmp.lt.s32.totalorder %s1051_s12, %s1051_s12 }
  0x24   : > { %p1054_p9 = pnand %p1052_p7, %p1040_p1  ;;  %p1061_p11 = por %p1060_p4, %p1059_p8 }
  0x26   : > { %p1055_p12 = pneg %p1054_p9 }
  0x28   : > { %p1062_p10 = pnand %p1061_p11, %p1055_p12 }
  0x2a   : > { %1065 = shalt.err (!%p1062_p10)
}
  0x2b   : > { %s1151_s17 = smov 256   ;;  %s1152_s20 = smov 16  }
  0x2c   : > { %968 = dma.hbm_to_vmem [thread:$0]  (!%p1264_p13), %s1415_s5, 4096, %s277_s18, [#allocation4], %s1151_s17, %s1151_s17, %s1152_s20  }
  0x2d   : > { %p1427_p0 = scmp.ne.s32.totalorder %s1424_s15, 0 }
  0x2e   : > { %p1428_p2 = scmp.ne.s32.totalorder (!%p1427_p0), %s1425_s16, 0 }
  0x2f   : > { %309 = sbr.rel (%p1427_p0) target bundleno = 549 (0x225), region = 48 }
  0x36   : > { %1119 = dma.done.wait (%p1428_p2), [#allocation4], 4096  }
  0x37   : > { %1121 = vsyncadd (%p1428_p2), [#allocation4], 4294963200  ;;  %s881_s22 = sshll.u32 %s1140_s27, 1  ;;  %vm395_vm0 = vcmask 261120   ;;  %v384_v0 = vld [vmem:[%s1411_s1] sm:$0xff]  ;;  %v385_v1 = vld [vmem:[%s1411_s1 + $0x8] sm:$0xff] }
  0x38   : > { %p355_p4 = scmp.lt.s32.totalorder %s881_s22, 7  ;;  %v386_v2 = vld [vmem:[%s1411_s1 + $0x10] sm:$0xff]  ;;  %v911_v3 = vpack.c.bf16 %v385_v1, %v384_v0  ;;  %v387_v4 = vld [vmem:[%s1411_s1 + $0x18] sm:$0xff]  ;;  %v592_v7 = vld [vmem:[#allocation3 + $0x8] sm:$0xff]  ;;  %v1153_v56 = vmov 0.0   ;;  %s351_s16 = sand.u32 1, %s1132_s25  }
  0x39   : > { %v915_v6 = vpack.c.bf16 %v387_v4, %v386_v2  ;;  %v594_v8 = vld [vmem:[#allocation3 + $0x18] sm:$0xff]  ;;  %v591_v9 = vld [vmem:[#allocation3] sm:$0xff]  ;;  %v593_v11 = vld [vmem:[#allocation3 + $0x10] sm:$0xff]  ;;  %699 = vmatprep.mubr.f32.mxu0 %v1153_v56  ;;  %s880_s20 = sshll.u32 %s351_s16, 4  ;;  %p1429_p10 = scmp.ne.s32.totalorder %s1422_s11, 0 }
  0x3a   : > { %s1439_s22 = smov (!%p355_p4, %s881_s22), 7  ;;  %912 = vmatprep.subr.bf16.mxu1 %v911_v3  ;;  %v927_v10 = vpack.c.bf16 %v594_v8, %v592_v7  ;;  %v596_v12 = vld [vmem:[#allocation3 + $0x28] sm:$0xff]  ;;  %v598_v13 = vld [vmem:[#allocation3 + $0x38] sm:$0xff]  ;;  %v929_v14 = vpack.c.bf16 %v593_v11, %v591_v9  ;;  %v595_v16 = vld [vmem:[#allocation3 + $0x20] sm:$0xff]  ;;  %s353_s21 = scalar_lea.vmem [#allocation6], %s880_s20 }
  0x3b   : > { %s882_s30 = sshll.u32 %s1439_s22, 3  ;;  %914 = vmatpush3.bf16.msra.mxu1 %v911_v3  ;;  %v931_v15 = vpack.c.bf16 %v598_v13, %v596_v12  ;;  %v597_v17 = vld [vmem:[#allocation3 + $0x30] sm:$0xff]  ;;  %v600_v18 = vld [vmem:[#allocation3 + $0x48] sm:$0xff]  ;;  %v602_v19 = vld [vmem:[#allocation3 + $0x58] sm:$0xff]  ;;  %v491_v13 = vlaneseq  ;;  %s745_s23 = sshll.u32 %s353_s21, 4  ;;  %s1357_s23 = int_to_ptr.vmem [resolvable:$true] %s745_s23 }
  0x3c   : > { %s1294_s10 = scalar_lea.vmem %s1410_s0, %s882_s30  ;;  %916 = vmatprep.subr.bf16.mxu1 %v915_v6  ;;  %928 = vmatprep.subr.bf16.mxu0 %v927_v10  ;;  %v933_v20 = vpack.c.bf16 %v597_v17, %v595_v16  ;;  %v935_v21 = vpack.c.bf16 %v602_v19, %v600_v18  ;;  %v599_v22 = vld [vmem:[#allocation3 + $0x40] sm:$0xff]  ;;  %v601_v23 = vld [vmem:[#allocation3 + $0x50] sm:$0xff]  ;;  %v604_v25 = vld [vmem:[#allocation3 + $0x68] sm:$0xff]  ;;  %s893_s22 = sshll.u32 %s1140_s27, 8 }
  0x3d   : > { %v1309_v5 = vld [vmem:[%s1294_s10] sm:$0xff]  ;;  %930 = vmatpush1.bf16.msra.mxu0 %v929_v14  ;;  %v1314_v24 = vld [vmem:[%s1294_s10 + $0x8] sm:$0xff]  ;;  %v606_v26 = vld [vmem:[#allocation3 + $0x78] sm:$0xff]  ;;  %v937_v27 = vpack.c.bf16 %v601_v23, %v599_v22  ;;  %v492_v14 = vshrl.u32 %v491_v13, 7  ;;  %s1362_s19 = scalar_lea.hbm %s1417_s7, %s893_s22  ;;  %s1364_s10 = scalar_lea.sflag [#allocation5], %s351_s16 }
  0x3e   : > { %908 = vmatprep.mubr.msk.f32.mxu1 %vm395_vm0, %v1309_v5  ;;  %932 = vmatprep.subr.bf16.mxu0 %v931_v15  ;;  %v939_v28 = vpack.c.bf16 %v606_v26, %v604_v25  ;;  %v603_v29 = vld [vmem:[#allocation3 + $0x60] sm:$0xff]  ;;  %v605_v30 = vld [vmem:[#allocation3 + $0x70] sm:$0xff]  ;;  %v608_v31 = vld [vmem:[#allocation3 + $0x88] sm:$0xff]  ;;  %s1066_s15 = scalar_lea.vmem %s1357_s23, 256  ;;  %s1154_s27 = smov [#allocation6]  }
  0x3f   : > { %918 = vmatpush3.bf16.msra.mxu1 %v915_v6  ;;  %v610_v32 = vld [vmem:[#allocation3 + $0x98] sm:$0xff]  ;;  %v941_v33 = vpack.c.bf16 %v605_v30, %v603_v29  ;;  %v607_v35 = vld [vmem:[#allocation3 + $0x80] sm:$0xff]  ;;  %v609_v36 = vld [vmem:[#allocation3 + $0x90] sm:$0xff]  ;;  %v497_v15 = vsub.s32 1, %v492_v14  ;;  %p1067_p8 = scmp.ne.s32.totalorder %s1357_s23, %s1066_s15  ;;  %s1070_s18 = sshll.u32 %s1154_s27, 4  ;;  %s1071_s18 = int_to_ptr.vmem [resolvable:$false] %s1070_s18 }
  0x40   : > { %v943_v34 = vpack.c.bf16 %v610_v32, %v608_v31  ;;  %v612_v37 = vld [vmem:[#allocation3 + $0xa8] sm:$0xff]  ;;  %v614_v38 = vld [vmem:[#allocation3 + $0xb8] sm:$0xff]  ;;  %v945_v39 = vpack.c.bf16 %v609_v36, %v607_v35  ;;  %v611_v41 = vld [vmem:[#allocation3 + $0xa0] sm:$0xff]  ;;  %s1072_s12 = scalar_lea.vmem %s1071_s18, 512  ;;  %p1073_p1 = scmp.lt.s32.totalorder %s1357_s23, %s1071_s18 }
  0x41   : > { %934 = vmatpush1.bf16.msra.mxu0 %v933_v20  ;;  %v947_v40 = vpack.c.bf16 %v614_v38, %v612_v37  ;;  %v613_v42 = vld [vmem:[#allocation3 + $0xb0] sm:$0xff]  ;;  %v616_v43 = vld [vmem:[#allocation3 + $0xc8] sm:$0xff]  ;;  %v618_v44 = vld [vmem:[#allocation3 + $0xd8] sm:$0xff]  ;;  %p1068_p11 = pnand %p1067_p8, %p1429_p10  ;;  %p1074_p3 = scmp.lt.s32.totalorder %s1072_s12, %s1066_s15 }
  0x42   : > { %909 = vmatmul.mubr.msk.f32.vlgmr.msra.gmra.mrb[0].mxu1 %vm395_vm0, %v1314_v24  ;;  %936 = vmatprep.subr.bf16.mxu0 %v935_v21  ;;  %v949_v45 = vpack.c.bf16 %v613_v42, %v611_v41  ;;  %v951_v46 = vpack.c.bf16 %v618_v44, %v616_v43  ;;  %v615_v47 = vld [vmem:[#allocation3 + $0xc0] sm:$0xff]  ;;  %v617_v48 = vld [vmem:[#allocation3 + $0xd0] sm:$0xff]  ;;  %v620_v50 = vld [vmem:[#allocation3 + $0xe8] sm:$0xff] }
  0x43   : > { %v953_v49 = vpack.c.bf16 %v617_v48, %v615_v47  ;;  %v622_v51 = vld [vmem:[#allocation3 + $0xf8] sm:$0xff]  ;;  %v619_v53 = vld [vmem:[#allocation3 + $0xe0] sm:$0xff]  ;;  %v621_v54 = vld [vmem:[#allocation3 + $0xf0] sm:$0xff]  ;;  %572 = vmatprep.mubr.f32.mxu1 %v1153_v56  ;;  %p1069_p13 = pneg %p1068_p11  ;;  %p1075_p5 = por %p1074_p3, %p1073_p1 }
  0x44   : > { %v955_v52 = vpack.c.bf16 %v622_v51, %v620_v50  ;;  %v957_v55 = vpack.c.bf16 %v621_v54, %v619_v53  ;;  %v482_v57 = vld [vmem:[%s1413_s3 + $0x8] sm:$0xff]  ;;  %v484_v58 = vld [vmem:[%s1413_s3 + $0x18] sm:$0xff]  ;;  %v481_v59 = vld [vmem:[%s1413_s3] sm:$0xff] }
  0x45   : > { %938 = vmatpush1.bf16.msra.mxu0 %v937_v27  ;;  %v919_v60 = vpack.c.bf16 %v484_v58, %v482_v57  ;;  %v483_v61 = vld [vmem:[%s1413_s3 + $0x10] sm:$0xff]  ;;  %v486_v62 = vld [vmem:[%s1413_s3 + $0x28] sm:$0xff]  ;;  %v488_v63 = vld [vmem:[%s1413_s3 + $0x38] sm:$0xff]  ;;  %p1076_p6 = pnand %p1075_p5, %p1069_p13 }
  0x46   : > { %940 = vmatprep.subr.bf16.mxu0 %v939_v28  ;;  %v921_v0 = vpack.c.bf16 %v483_v61, %v481_v59  ;;  %v923_v1 = vpack.c.bf16 %v488_v63, %v486_v62  ;;  %v485_v2 = vld [vmem:[%s1413_s3 + $0x20] sm:$0xff]  ;;  %v487_v3 = vld [vmem:[%s1413_s3 + $0x30] sm:$0xff] }
  0x47   : > { %920 = vmatprep.subr.bf16.mxu1 %v919_v60  ;;  %v925_v4 = vpack.c.bf16 %v487_v3, %v485_v2  ;;  %v883_v6 = vld [vmem:[%s1412_s2] ss:$0 sm:$0xff] }
  0x48   : > { %922 = vmatpush1.bf16.msra.mxu1 %v921_v0  ;;  %v489_v16 = vld [vmem:[%s1414_s4] sm:$0x3] }
  0x49   : > { %942 = vmatpush1.bf16.msra.mxu0 %v941_v33  ;;  %924 = vmatprep.subr.bf16.mxu1 %v923_v1  ;;  %v498_v19 = vrot.slane %v489_v16, %v497_v15  ;;  %v623_v33 = vld [vmem:[%s1416_s6] sm:$0x3] }
  0x4a   : > { %944 = vmatprep.subr.bf16.mxu0 %v943_v34  ;;  %v632_v35 = vrot.slane %v623_v33, %v497_v15 }
  0x4c   : > { %926 = vmatpush1.bf16.msra.mxu1 %v925_v4 }
  0x4d   : > { %946 = vmatpush1.bf16.msra.mxu0 %v945_v39 }
  0x4e   : > { %948 = vmatprep.subr.bf16.mxu0 %v947_v40 }
  0x4f   : > { %886 = vmatmul.mubr.msk.f32.vlgmr.msra.gmra.mrb[2].mxu1 %vm395_vm0, %v1309_v5  ;;  %v493_v5 = vsub.s32 0, %v492_v14 }
  0x50   : > { %578 = vmatprep.mubr.f32.mxu1 %v1153_v56 }
  0x51   : > { %950 = vmatpush1.bf16.msra.mxu0 %v949_v45  ;;  %v494_v17 = vrot.slane %v489_v16, %v493_v5  ;;  %v628_v34 = vrot.slane %v623_v33, %v493_v5 }
  0x52   : > { %952 = vmatprep.subr.bf16.mxu0 %v951_v46 }
  0x53   : > { %887 = vmatmul.mubr.msk.f32.gmra.mrb[4].mxu1 %vm395_vm0, %v1314_v24 }
  0x55   : > { %954 = vmatpush1.bf16.msra.mxu0 %v953_v49 }
  0x56   : > { %956 = vmatprep.subr.bf16.mxu0 %v955_v52 }
  0x59   : > { %958 = vmatpush1.bf16.msra.mxu0 %v957_v55 }
 0x115   : > { %v910_v7 = vpop.f32.mrb[0].mxu1 }
 0x116   : > { %v468_v8 = vpop.f32.mrb[1].mxu1  ;;  %v474_v10 = vadd.f32 %v910_v7, %v883_v6 }
 0x117   : > { %v469_v9 = vadd.f32 %v883_v6, %v468_v8 }
 0x118   : > { %v478_v12 = vmax.f32 %v474_v10, 0.0 }
 0x119   : > { %v477_v11 = vmax.f32 %v469_v9, 0.0 }
 0x11b   : > { %700 = vmatmul.mubr.f32.vlgmr.msra.gmra.mrb[0].mxu0 %v477_v11 }
 0x11c   : > { %705 = vmatprep.mubr.f32.mxu0 %v1153_v56 }
 0x11f   : > { %706 = vmatmul.mubr.f32.gmra.mrb[2].mxu0 %v478_v12 }
 0x122   : > { %v574_v18 = vpop.f32.mrb[2].mxu1 }
 0x123   : > { %v576_v20 = vpop.f32.mrb[3].mxu1  ;;  %v575_v21 = vadd.f32 %v574_v18, %v494_v17 }
 0x124   : > { %v577_v22 = vadd.f32 %v576_v20, %v498_v19 }
 0x125   : > { %v585_v23 = vmax.f32 %v575_v21, 0.0 }
 0x126   : > { %v586_v24 = vmax.f32 %v577_v22, 0.0  ;;  %v580_v25 = vpop.f32.mrb[4].mxu1 }
 0x127   : > { %v582_v26 = vpop.f32.mrb[5].mxu1  ;;  %v581_v28 = vadd.f32 %v580_v25, %v494_v17 }
 0x128   : > { %v722_v27 = vsub.f32 %v585_v23, %v586_v24  ;;  %v583_v29 = vadd.f32 %v582_v26, %v498_v19 }
 0x129   : > { %v587_v30 = vmax.f32 %v581_v28, 0.0 }
 0x12a   : > { %v588_v31 = vmax.f32 %v583_v29, 0.0 }
 0x12c   : > { %v723_v32 = vsub.f32 %v587_v30, %v588_v31 }
 0x1ee   : > { %v701_v36 = vpop.f32.mrb[0].mxu0 }
 0x1ef   : > { %v702_v37 = vadd.f32 %v701_v36, %v628_v34  ;;  %v703_v38 = vpop.f32.mrb[1].mxu0 }
 0x1f0   : > { %v704_v39 = vadd.f32 %v703_v38, %v632_v35 }
 0x1f2   : > { %v712_v40 = vsub.f32 %v704_v39, %v702_v37  ;;  %v707_v41 = vpop.f32.mrb[2].mxu0 }
 0x1f3   : > { %v708_v42 = vadd.f32 %v707_v41, %v628_v34  ;;  %v709_v43 = vpop.f32.mrb[3].mxu0 }
 0x1f4   : > { %v714_v44 = vmul.f32 1.442695, %v712_v40  ;;  %v710_v45 = vadd.f32 %v709_v43, %v632_v35 }
 0x1f6   : > { %1030 = vpow2.f32 %v714_v44  ;;  %v713_v46 = vsub.f32 %v710_v45, %v708_v42 }
 0x1f8   : > { %v716_v47 = vmul.f32 1.442695, %v713_v46 }
 0x1fa   : > { %1032 = vpow2.f32 %v716_v47 }
 0x200   : > { %v1031_v48 = vpop.eup %1030 }
 0x201   : > { %v718_v49 = vadd.f32 1.0, %v1031_v48 }
 0x203   : > { %1034 = vrcp.f32 %v718_v49 }
 0x204   : > { %v1033_v50 = vpop.eup %1032 }
 0x205   : > { %v719_v51 = vadd.f32 1.0, %v1033_v50 }
 0x207   : > { %1036 = vrcp.f32 %v719_v51 }
 0x20d   : > { %v1035_v52 = vpop.eup %1034 }
 0x20e   : > { %v724_v53 = vmul.f32 %v1035_v52, %v722_v27 }
 0x210   : > { %v726_v54 = vadd.f32 %v724_v53, %v586_v24 }
 0x211   : > { %v1037_v55 = vpop.eup %1036 }
 0x212   : > { %728 = vst [vmem:[%s353_s21] sm:$0xff] %v726_v54  ;;  %v725_v56 = vmul.f32 %v1037_v55, %v723_v32 }
 0x214   : > { %v727_v57 = vadd.f32 %v725_v56, %v588_v31 }
 0x216   : > { %729 = vst [vmem:[%s353_s21 + $0x8] sm:$0xff] %v727_v57 }
 0x217   : > { %1079 = shalt.err (!%p1076_p6)
}
 0x218   : > { %s1080_s17 = scalar_lea.hbm %s1362_s19, 256  ;;  %s1084_s21 = scalar_lea.hbm %s1417_s7, 1024 }
 0x219   : > { %p1081_p7 = scmp.ne.s32.totalorder %s1362_s19, %s1080_s17  ;;  %p1085_p0 = scmp.lt.u32.totalorder %s1362_s19, %s1417_s7 }
 0x21a   : > { %p1086_p2 = scmp.lt.u32.totalorder %s1084_s21, %s1080_s17  ;;  %p1088_p8 = scmp.lt.u32.totalorder %s1080_s17, %s1362_s19 }
 0x21b   : > { %p1082_p9 = pnand %p1081_p7, %p1429_p10 }
 0x21c   : > { %p1087_p4 = por %p1086_p2, %p1085_p0 }
 0x21d   : > { %p1083_p12 = pneg %p1082_p9 }
 0x21e   : > { %p1089_p11 = por %p1088_p8, %p1087_p4 }
 0x220   : > { %p1090_p13 = pnand %p1089_p11, %p1083_p12 }
 0x222   : > { %1093 = shalt.err (!%p1090_p13)
}
 0x223   : > { %s1155_s8 = smov 128   ;;  %s1156_s15 = smov 8  }
 0x224   : > { %963 = dma.vmem_to_hbm [thread:$0]  (%p1429_p10), %s1357_s23, 256, %s1362_s19, %s1364_s10, %s1155_s8, %s1155_s8, %s1156_s15  }
 0x225 PF: > { %p975_p1 = scmp.ge.s32.totalorder %s1148_s29, 2  ;;  %s760_s27 = sand.u32 1, %s1128_s24  }
 0x226   : > { %p1430_p3 = scmp.ne.s32.totalorder %s1423_s13, 0  ;;  %s761_s18 = scalar_lea.sflag [#allocation5], %s760_s27 }
 0x228   : > { %p970_p5 = pnand %p975_p1, %p1430_p3 }
 0x22a   : > { %1123 = dma.done.wait (!%p970_p5), %s761_s18, 256  }
 0x22b   : > { %1125 = vsyncadd (!%p970_p5), %s761_s18, 4294967040  ;;  %s21_s29 = sadd.s32 1, %s1148_s29   ;;  %s1431_s24 = smov %s1132_s25 }
 0x22c   : > { %p18_p6 = scmp.ge.s32.totalorder %s21_s29, 6   ;;  %s1432_s25 = smov %s1136_s26 }
 0x22d   : > { %s1433_s26 = smov %s1250_s14  ;;  %s1434_s27 = smov %s1144_s28 }
 0x22e   : > { %s1435_s28 = smov %s1437_s9  ;;  %20 = sbr.rel (!%p18_p6) target bundleno = 5 (0x5), region = 102 }
 0x235   :  { %766 = vsyncpa [#allocation4], 1 }
 0x236   :  { %768 = vsyncpa [#allocation4 + $0x1], 1 }
 0x237   :  { %769 = vsyncpa [#allocation5], 1 }
 0x238   :  { %771 = vsyncpa [#allocation5 + $0x1], 1 }

</bundles_post_ra>
